<compile_context>
chip_gen: v7x
topology: tpu7x:2x2x1
jax: 0.10.0
libtpu: 0.0.40
codegen_flags: <defaults>
</compile_context>

<pallas_src>
import functools

import jax
import jax.numpy as jnp
from jax.experimental import pallas as pl
from jax.experimental.pallas import tpu as pltpu


def _round_up(x, m):
    return ((x + m - 1) // m) * m


def _mlp_fused_kernel(*refs, num_layers):
    # refs = (x_ref, w0_ref, b0_ref, w1_ref, b1_ref, ..., o_ref)
    # x_ref: (tm, in_pad) f32   w_i: (in_i_pad, out_i_pad) bf16   b_i: (1, out_i_pad) f32
    x_ref = refs[0]
    o_ref = refs[-1]
    h = x_ref[...]
    for i in range(num_layers):
        w_ref = refs[1 + 2 * i]
        b_ref = refs[2 + 2 * i]
        # bf16 operands on the MXU, f32 accumulation.
        h = jnp.dot(h.astype(w_ref.dtype), w_ref[...],
                    preferred_element_type=jnp.float32)
        h = h + b_ref[...]                      # broadcast (1, out) over rows, f32 VPU
        if i != num_layers - 1:
            h = jnp.maximum(h, 0.0)             # ReLU on every layer but the last
    o_ref[...] = h.astype(o_ref.dtype)


def init_mlp_params(key, input_size, output_size, hidden_layers):
    """nn.Linear-style init: uniform(-1/sqrt(fan_in), 1/sqrt(fan_in)), W stored
    PyTorch-style as (out_features, in_features), f32."""
    dims = [input_size] + list(hidden_layers) + [output_size]
    params = []
    for i in range(len(dims) - 1):
        fan_in, fan_out = dims[i], dims[i + 1]
        key, kw, kb = jax.random.split(key, 3)
        bound = 1.0 / (fan_in ** 0.5)
        w = jax.random.uniform(kw, (fan_out, fan_in), jnp.float32, -bound, bound)
        b = jax.random.uniform(kb, (fan_out,), jnp.float32, -bound, bound)
        params.append((w, b))
    return params


def pack_params(params):
    """One-time preprocessing (outside the forward pass): W -> (in, out), zero-padded
    to lane multiples of 128, cast to bf16 for the MXU; bias -> (1, out_pad) f32.
    Zero padding is exact: padded K rows are zero, padded N cols get zero bias."""
    packed = []
    for w, b in params:
        out_f, in_f = w.shape
        in_p = _round_up(in_f, 128)
        out_p = _round_up(out_f, 128)
        w_t = jnp.zeros((in_p, out_p), jnp.float32).at[:in_f, :out_f].set(w.T)
        b_p = jnp.zeros((1, out_p), jnp.float32).at[0, :out_f].set(b)
        packed.append((w_t.astype(jnp.bfloat16), b_p))
    return packed


def mlp_forward(x, packed_params, output_size):
    """Replicates MLP.forward: flatten NCHW row-major (== x.view(x.size(0), -1)),
    then the fused Linear(+ReLU) stack; no activation / softmax on the last layer."""
    n = x.shape[0]
    h = x.reshape(n, -1)
    in_features = h.shape[1]
    in_pad = packed_params[0][0].shape[0]
    out_pad = packed_params[-1][0].shape[1]

    # Only the reduced K/feature dim needs true-zero padding; batch rows are
    # independent, so the partial last M block is simply masked by Pallas.
    if in_features != in_pad:
        h = jnp.pad(h, ((0, 0), (0, in_pad - in_features)))

    # M tile: large tiles amortize per-step overhead; weights are VMEM-resident,
    # so only the activation/output tiles stream per grid step.
    if n >= 1024:
        tm = 512
    elif n >= 256:
        tm = 256
    elif n >= 128:
        tm = 128
    else:
        tm = _round_up(max(n, 8), 8)

    weight_bytes = sum(w.size * w.dtype.itemsize + b.size * b.dtype.itemsize
                       for (w, b) in packed_params)

    def tile_bytes(t):
        # double-buffered activation input + double-buffered output tile (f32)
        return 2 * t * in_pad * 4 + 2 * t * out_pad * 4

    # Keep resident weights + streaming tiles under a conservative VMEM budget
    # (v7x has only 64 MiB physical VMEM per TensorCore pair).
    while tm > 128 and weight_bytes + tile_bytes(tm) > (48 << 20):
        tm //= 2
    # TODO(synk): for layers whose packed weight exceeds ~8-16 MiB, stream that
    # layer's weight over K/N grid axes (or pltpu.emit_pipeline) instead of
    # keeping every weight VMEM-resident.

    vmem_limit = int(min(max(weight_bytes + tile_bytes(tm) + (4 << 20), 32 << 20),
                         64 << 20))

    num_layers = len(packed_params)
    kernel = functools.partial(_mlp_fused_kernel, num_layers=num_layers)

    in_specs = [pl.BlockSpec((tm, in_pad), lambda i: (i, 0))]
    flat_args = [h]
    for (w_t, b_p) in packed_params:
        # Constant index_map -> fetched once and kept resident; single-buffer to
        # halve the reserved VMEM for these blocks.
        in_specs.append(pl.BlockSpec(w_t.shape, lambda i: (0, 0),
                                     pipeline_mode=pl.Buffered(1)))
        in_specs.append(pl.BlockSpec(b_p.shape, lambda i: (0, 0),
                                     pipeline_mode=pl.Buffered(1)))
        flat_args.append(w_t)
        flat_args.append(b_p)

    out = pl.pallas_call(
        kernel,
        out_shape=jax.ShapeDtypeStruct((n, out_pad), jnp.float32),
        grid_spec=pltpu.PrefetchScalarGridSpec(
            num_scalar_prefetch=0,
            grid=(pl.cdiv(n, tm),),
            in_specs=in_specs,
            out_specs=pl.BlockSpec((tm, out_pad), lambda i: (i, 0)),
        ),
        compiler_params=pltpu.CompilerParams(
            dimension_semantics=("parallel",),
            vmem_limit_bytes=vmem_limit),
    )(*flat_args)

    return out[:, :output_size]


if __name__ == "__main__":
    key = jax.random.PRNGKey(0)
    k_x, k_p = jax.random.split(key)

    # Small shapes consistent with the module: batch=2, channels=4, spatial=16.
    x = jax.random.normal(k_x, (2, 4, 16, 16), jnp.float32)  # NCHW
    input_size = 4 * 16 * 16  # 1024 (already a multiple of 128 -> no feature pad)
    hidden_layers = [32, 32]
    output_size = 8

    params = init_mlp_params(k_p, input_size, output_size, hidden_layers)
    packed = pack_params(params)  # one-time transpose + lane padding + bf16 cast

    fwd = jax.jit(functools.partial(mlp_forward, output_size=output_size))
    out = fwd(x, packed)
    jax.block_until_ready(out)

    # Pure-JAX f32 reference check (bf16 MXU operands + f32 accumulation in the
    # kernel -> loosened tolerance vs. the pure-f32 reference).
    h = x.reshape(x.shape[0], -1)
    for i, (w, b) in enumerate(params):
        h = h @ w.T + b
        if i != len(params) - 1:
            h = jnp.maximum(h, 0.0)
    assert out.shape == (2, output_size)
    err = float(jnp.max(jnp.abs(out - h)))
    assert jnp.allclose(out, h, atol=5e-2, rtol=5e-2), f"max abs err {err}"

    print("KERNEL_OK")
</pallas_src>

<mosaic_0001>
module attributes {stable_mosaic.version = 11 : i64} {
  func.func @_mlp_fused_kernel(%arg0: i32, %arg1: memref<8x1024xf32, #tpu.memory_space<vmem>>, %arg2: memref<1024x128xbf16, #tpu.memory_space<vmem>>, %arg3: memref<1x128xf32, #tpu.memory_space<vmem>>, %arg4: memref<128x128xbf16, #tpu.memory_space<vmem>>, %arg5: memref<1x128xf32, #tpu.memory_space<vmem>>, %arg6: memref<128x128xbf16, #tpu.memory_space<vmem>>, %arg7: memref<1x128xf32, #tpu.memory_space<vmem>>, %arg8: memref<8x128xf32, #tpu.memory_space<vmem>>) attributes {dimension_semantics = [#tpu.dimension_semantics<parallel>], iteration_bounds = array<i64: 1>, scalar_prefetch = 0 : i64, scratch_operands = 0 : i64, tpu.core_type = #tpu.core_type<tc>, window_params = [{transform_indices = @transform_0, window_bounds = array<i64: 8, 1024>}, {pipeline_mode = #tpu.pipeline_mode<synchronous>, transform_indices = @transform_1, window_bounds = array<i64: 1024, 128>}, {pipeline_mode = #tpu.pipeline_mode<synchronous>, transform_indices = @transform_2, window_bounds = array<i64: 1, 128>}, {pipeline_mode = #tpu.pipeline_mode<synchronous>, transform_indices = @transform_3, window_bounds = array<i64: 128, 128>}, {pipeline_mode = #tpu.pipeline_mode<synchronous>, transform_indices = @transform_4, window_bounds = array<i64: 1, 128>}, {pipeline_mode = #tpu.pipeline_mode<synchronous>, transform_indices = @transform_5, window_bounds = array<i64: 128, 128>}, {pipeline_mode = #tpu.pipeline_mode<synchronous>, transform_indices = @transform_6, window_bounds = array<i64: 1, 128>}, {transform_indices = @transform_7, window_bounds = array<i64: 8, 128>}]} {
    %c0 = arith.constant 0 : index
    %c0_0 = arith.constant 0 : index
    %0 = vector.load %arg1[%c0, %c0_0] : memref<8x1024xf32, #tpu.memory_space<vmem>>, vector<8x1024xf32>
    %1 = arith.truncf %0 : vector<8x1024xf32> to vector<8x1024xbf16>
    %c0_1 = arith.constant 0 : index
    %c0_2 = arith.constant 0 : index
    %2 = vector.load %arg2[%c0_1, %c0_2] : memref<1024x128xbf16, #tpu.memory_space<vmem>>, vector<1024x128xbf16>
    %cst = arith.constant dense<0.000000e+00> : vector<8x128xf32>
    %3 = tpu.matmul %1, %2, %cst {dimension_numbers = #tpu.dot_dimension_numbers<[1], [0], [0], [1], [0, 0, 1, 1], [], []>} : vector<8x1024xbf16>, vector<1024x128xbf16>, vector<8x128xf32> -> vector<8x128xf32>
    %c0_3 = arith.constant 0 : index
    %c0_4 = arith.constant 0 : index
    %4 = vector.load %arg3[%c0_3, %c0_4] : memref<1x128xf32, #tpu.memory_space<vmem>>, vector<1x128xf32>
    %5 = vector.broadcast %4 : vector<1x128xf32> to vector<8x128xf32>
    %6 = arith.addf %3, %5 : vector<8x128xf32>
    %cst_5 = arith.constant 0.000000e+00 : f32
    %7 = vector.broadcast %cst_5 : f32 to vector<8x128xf32>
    %8 = arith.maximumf %6, %7 : vector<8x128xf32>
    %9 = arith.truncf %8 : vector<8x128xf32> to vector<8x128xbf16>
    %c0_6 = arith.constant 0 : index
    %c0_7 = arith.constant 0 : index
    %10 = vector.load %arg4[%c0_6, %c0_7] : memref<128x128xbf16, #tpu.memory_space<vmem>>, vector<128x128xbf16>
    %cst_8 = arith.constant dense<0.000000e+00> : vector<8x128xf32>
    %11 = tpu.matmul %9, %10, %cst_8 {dimension_numbers = #tpu.dot_dimension_numbers<[1], [0], [0], [1], [0, 0, 1, 1], [], []>} : vector<8x128xbf16>, vector<128x128xbf16>, vector<8x128xf32> -> vector<8x128xf32>
    %c0_9 = arith.constant 0 : index
    %c0_10 = arith.constant 0 : index
    %12 = vector.load %arg5[%c0_9, %c0_10] : memref<1x128xf32, #tpu.memory_space<vmem>>, vector<1x128xf32>
    %13 = vector.broadcast %12 : vector<1x128xf32> to vector<8x128xf32>
    %14 = arith.addf %11, %13 : vector<8x128xf32>
    %cst_11 = arith.constant 0.000000e+00 : f32
    %15 = vector.broadcast %cst_11 : f32 to vector<8x128xf32>
    %16 = arith.maximumf %14, %15 : vector<8x128xf32>
    %17 = arith.truncf %16 : vector<8x128xf32> to vector<8x128xbf16>
    %c0_12 = arith.constant 0 : index
    %c0_13 = arith.constant 0 : index
    %18 = vector.load %arg6[%c0_12, %c0_13] : memref<128x128xbf16, #tpu.memory_space<vmem>>, vector<128x128xbf16>
    %cst_14 = arith.constant dense<0.000000e+00> : vector<8x128xf32>
    %19 = tpu.matmul %17, %18, %cst_14 {dimension_numbers = #tpu.dot_dimension_numbers<[1], [0], [0], [1], [0, 0, 1, 1], [], []>} : vector<8x128xbf16>, vector<128x128xbf16>, vector<8x128xf32> -> vector<8x128xf32>
    %c0_15 = arith.constant 0 : index
    %c0_16 = arith.constant 0 : index
    %20 = vector.load %arg7[%c0_15, %c0_16] : memref<1x128xf32, #tpu.memory_space<vmem>>, vector<1x128xf32>
    %21 = vector.broadcast %20 : vector<1x128xf32> to vector<8x128xf32>
    %22 = arith.addf %19, %21 : vector<8x128xf32>
    %c0_17 = arith.constant 0 : index
    %c0_18 = arith.constant 0 : index
    %23 = vector.load %arg8[%c0_17, %c0_18] : memref<8x128xf32, #tpu.memory_space<vmem>>, vector<8x128xf32>
    tpu.vector_store %arg8[%c0_17, %c0_18], %22 {strides = array<i32>} : memref<8x128xf32, #tpu.memory_space<vmem>>, vector<8x128xf32>,
    return
  }
  func.func @transform_0(%arg0: i32) -> (i32, i32) {
    %c0_i32 = arith.constant 0 : i32
    %c0_i32_0 = arith.constant 0 : i32
    return %arg0, %c0_i32 : i32, i32
  }
  func.func @transform_1(%arg0: i32) -> (i32, i32) {
    %c0_i32 = arith.constant 0 : i32
    %c0_i32_0 = arith.constant 0 : i32
    %c0_i32_1 = arith.constant 0 : i32
    return %c0_i32, %c0_i32_0 : i32, i32
  }
  func.func @transform_2(%arg0: i32) -> (i32, i32) {
    %c0_i32 = arith.constant 0 : i32
    %c0_i32_0 = arith.constant 0 : i32
    %c0_i32_1 = arith.constant 0 : i32
    return %c0_i32, %c0_i32_0 : i32, i32
  }
  func.func @transform_3(%arg0: i32) -> (i32, i32) {
    %c0_i32 = arith.constant 0 : i32
    %c0_i32_0 = arith.constant 0 : i32
    %c0_i32_1 = arith.constant 0 : i32
    return %c0_i32, %c0_i32_0 : i32, i32
  }
  func.func @transform_4(%arg0: i32) -> (i32, i32) {
    %c0_i32 = arith.constant 0 : i32
    %c0_i32_0 = arith.constant 0 : i32
    %c0_i32_1 = arith.constant 0 : i32
    return %c0_i32, %c0_i32_0 : i32, i32
  }
  func.func @transform_5(%arg0: i32) -> (i32, i32) {
    %c0_i32 = arith.constant 0 : i32
    %c0_i32_0 = arith.constant 0 : i32
    %c0_i32_1 = arith.constant 0 : i32
    return %c0_i32, %c0_i32_0 : i32, i32
  }
  func.func @transform_6(%arg0: i32) -> (i32, i32) {
    %c0_i32 = arith.constant 0 : i32
    %c0_i32_0 = arith.constant 0 : i32
    %c0_i32_1 = arith.constant 0 : i32
    return %c0_i32, %c0_i32_0 : i32, i32
  }
  func.func @transform_7(%arg0: i32) -> (i32, i32) {
    %c0_i32 = arith.constant 0 : i32
    %c0_i32_0 = arith.constant 0 : i32
    return %arg0, %c0_i32 : i32, i32
  }
}

</mosaic_0001>

<bundles_post_ra>
// kernel: mlp_forward.1
= control target key start
LH: loop header
LB: loop body
LE: loop exit
PB: predicated region body
PF: predicated region fallthrough
CT: control target
= control target key end

     0   :  { %12 = vsyncpa [#allocation3], 0  ;;  %s1629_s0 = inlined_call_operand.vmem [shape: f32[2,1024], index: 0, kind: input, shape index: {}]   ;;  %s1630_s1 = inlined_call_operand.hbm [shape: bf16[1024,128], index: 1, kind: input, shape index: {}]   ;;  %s1631_s2 = inlined_call_operand.vmem [shape: f32[1,128], index: 2, kind: input, shape index: {}]   ;;  %s1632_s3 = inlined_call_operand.vmem [shape: bf16[128,128], index: 3, kind: input, shape index: {}]   ;;  %s1633_s4 = inlined_call_operand.vmem [shape: f32[1,128], index: 4, kind: input, shape index: {}]   ;;  %s1634_s5 = inlined_call_operand.vmem [shape: bf16[128,128], index: 5, kind: input, shape index: {}]   ;;  %s1635_s6 = inlined_call_operand.vmem [shape: f32[1,128], index: 6, kind: input, shape index: {}]   ;;  %s1636_s7 = inlined_call_operand.hbm [shape: f32[2,128], index: 7, kind: output, shape index: {}]  }
   0x1   :  { %13 = vsyncpa [#allocation4], 0  ;;  %s1447_s24 = smov [#allocation2]   ;;  %s1399_s28 = scalar_lea.hbm %s1630_s1, 8192 }
   0x2   :  { %s21_s25 = sshll.u32 %s1447_s24, 4  ;;  %p1400_p0 = scmp.ne.s32.totalorder %s1630_s1, %s1399_s28  ;;  %s22_s25 = int_to_ptr.vmem [resolvable:$true] %s21_s25 }
   0x3   :  { %p1403_p1 = scmp.lt.u32.totalorder %s1399_s28, %s1630_s1 }
   0x5   :  { %p1405_p2 = pnand %p1403_p1, %p1400_p0 }
   0x7   :  { %1408 = shalt.err (!%p1405_p2)
}
   0x8   :  { %s1409_s10 = scalar_lea.vmem %s22_s25, 8192  ;;  %p1414_p4 = scmp.lt.s32.totalorder %s22_s25, %s22_s25 }
   0x9   :  { %p1410_p3 = scmp.ne.s32.totalorder %s22_s25, %s1409_s10  ;;  %p1415_p5 = scmp.lt.s32.totalorder %s1409_s10, %s1409_s10 }
   0xb   :  { %p1416_p6 = por %p1415_p5, %p1414_p4 }
   0xd   :  { %p1417_p7 = pnand %p1416_p6, %p1410_p3 }
   0xf   :  { %1420 = shalt.err (!%p1417_p7)
}
  0x10   :  { %s1448_s11 = smov 64   ;;  %s1449_s12 = smov 4  }
  0x11   :  { %27 = dma.hbm_to_vmem [thread:$0]  %s1630_s1, 8192, %s22_s25, [#allocation3], %s1448_s11, %s1448_s11, %s1449_s12  }
  0x12   :  { %1443 = dma.done.wait [#allocation3], 8192  }
  0x13   :  { %1444 = vsyncadd [#allocation3], 4294959104  ;;  %v1307_v0 = vld [vmem:[#allocation2 + $0x40] sm:$0xff]   ;;  %v1311_v4 = vld [vmem:[#allocation2 + $0x48] sm:$0xff]   ;;  %v1450_v24 = vmov 1983009808   ;;  %v65_v26 = vlaneseq }
  0x14   :  { %v1308_v1 = vld [vmem:[#allocation2 + $0xc0] sm:$0xff]   ;;  %1152 = vmatprep.subr.bf16.mxu0 %v1307_v0  ;;  %v1312_v5 = vld [vmem:[#allocation2 + $0xc8] sm:$0xff]   ;;  %v1315_v8 = vld [vmem:[#allocation2 + $0x50] sm:$0xff]   ;;  %v63_v25 = vunpack.c.l.s4 %v1450_v24  ;;  %vm1452_vm0 = vmmov 0  }
  0x15   :  { %v1309_v2 = vld [vmem:[#allocation2] sm:$0xff]   ;;  %1174 = vmatprep.subr.bf16.mxu1 %v1308_v1  ;;  %v1313_v6 = vld [vmem:[#allocation2 + $0x8] sm:$0xff]   ;;  %v1316_v9 = vld [vmem:[#allocation2 + $0xd0] sm:$0xff]   ;;  %v66_v32 = vshrl.u32 %v65_v26, 7 }
  0x16   :  { %v1310_v3 = vld [vmem:[#allocation2 + $0x80] sm:$0xff]   ;;  %1153 = vmatpush3.bf16.msra.mxu0 %v1309_v2  ;;  %v1314_v7 = vld [vmem:[#allocation2 + $0x88] sm:$0xff]   ;;  %v1317_v10 = vld [vmem:[#allocation2 + $0x10] sm:$0xff]   ;;  %v64_v31 = vunpack.c.0.s8 %v63_v25 }
  0x17   :  { %1175 = vmatpush3.bf16.msra.mxu1 %v1310_v3  ;;  %1154 = vmatprep.subr.bf16.mxu0 %v1311_v4  ;;  %v1318_v11 = vld [vmem:[#allocation2 + $0x90] sm:$0xff]   ;;  %v1319_v12 = vld [vmem:[#allocation2 + $0x58] sm:$0xff]   ;;  %v1323_v16 = vld [vmem:[#allocation2 + $0x60] sm:$0xff]  }
  0x18   :  { %1176 = vmatprep.subr.bf16.mxu1 %v1312_v5  ;;  %v1320_v13 = vld [vmem:[#allocation2 + $0xd8] sm:$0xff]   ;;  %v1324_v17 = vld [vmem:[#allocation2 + $0xe0] sm:$0xff]   ;;  %v1327_v20 = vld [vmem:[#allocation2 + $0x68] sm:$0xff]   ;;  %v1508_v37 = vsub.s32 %v64_v31, %v66_v32 }
  0x19   :  { %v1321_v14 = vld [vmem:[#allocation2 + $0x18] sm:$0xff]   ;;  %v1325_v18 = vld [vmem:[#allocation2 + $0x20] sm:$0xff]   ;;  %v1328_v21 = vld [vmem:[#allocation2 + $0xe8] sm:$0xff]  }
  0x1a   :  { %1155 = vmatpush3.bf16.msra.mxu0 %v1313_v6  ;;  %v1322_v15 = vld [vmem:[#allocation2 + $0x98] sm:$0xff]   ;;  %v1326_v19 = vld [vmem:[#allocation2 + $0xa0] sm:$0xff]   ;;  %v1329_v22 = vld [vmem:[#allocation2 + $0x28] sm:$0xff]  }
  0x1b   :  { %1177 = vmatpush3.bf16.msra.mxu1 %v1314_v7  ;;  %1156 = vmatprep.subr.bf16.mxu0 %v1315_v8  ;;  %v1330_v23 = vld [vmem:[#allocation2 + $0xa8] sm:$0xff]   ;;  %v1331_v27 = vld [vmem:[#allocation2 + $0x70] sm:$0xff]   ;;  %v1335_v33 = vld [vmem:[#allocation2 + $0x78] sm:$0xff]  }
  0x1c   :  { %1178 = vmatprep.subr.bf16.mxu1 %v1316_v9  ;;  %v1332_v28 = vld [vmem:[#allocation2 + $0xf0] sm:$0xff]   ;;  %v1336_v34 = vld [vmem:[#allocation2 + $0xf8] sm:$0xff]   ;;  %v1345_v44 = vld [vmem:[#allocation2 + $0x140] sm:$0xff]  }
  0x1d   :  { %v1333_v29 = vld [vmem:[#allocation2 + $0x30] sm:$0xff]   ;;  %v1337_v35 = vld [vmem:[#allocation2 + $0x38] sm:$0xff]   ;;  %v1346_v47 = vld [vmem:[#allocation2 + $0x1c0] sm:$0xff]  }
  0x1e   :  { %1157 = vmatpush3.bf16.msra.mxu0 %v1317_v10  ;;  %v1334_v30 = vld [vmem:[#allocation2 + $0xb0] sm:$0xff]   ;;  %v1338_v36 = vld [vmem:[#allocation2 + $0xb8] sm:$0xff]   ;;  %v1347_v50 = vld [vmem:[#allocation2 + $0x100] sm:$0xff]  }
  0x1f   :  { %1179 = vmatpush3.bf16.msra.mxu1 %v1318_v11  ;;  %1158 = vmatprep.subr.bf16.mxu0 %v1319_v12  ;;  %v1339_v38 = vld [vmem:[%s1629_s0] ss:$16 sps:$4 sm:$0xff]   ;;  %v1343_v40 = vld [vmem:[%s1629_s0 + $0x4] ss:$16 sps:$4 sm:$0xff]   ;;  %v1349_v56 = vld [vmem:[#allocation2 + $0x148] sm:$0xff]  }
  0x20   :  { %1180 = vmatprep.subr.bf16.mxu1 %v1320_v13  ;;  %v1341_v39 = vld [vmem:[%s1629_s0 + $0x20] ss:$16 sps:$4 sm:$0xff]   ;;  %v1344_v41 = vld [vmem:[%s1629_s0 + $0x24] ss:$16 sps:$4 sm:$0xff]   ;;  %v68_v42 = vrot.slane %v1339_v38, %v1508_v37  ;;  %v75_v45 = vrot.slane %v1343_v40, %v1508_v37  ;;  %v1350_v59 = vld [vmem:[#allocation2 + $0x1c8] sm:$0xff]   ;;  %v1451_v40 = vmov 0.0  }
  0x21   :  { %v82_v43 = vrot.slane %v1341_v39, %v1508_v37  ;;  %v89_v46 = vrot.slane %v1344_v41, %v1508_v37  ;;  %v1348_v53 = vld [vmem:[#allocation2 + $0x180] sm:$0xff]   ;;  %v1351_v60 = vld [vmem:[#allocation2 + $0x108] sm:$0xff]   ;;  %v1353_v62 = vld [vmem:[#allocation2 + $0x150] sm:$0xff]  }
  0x22   :  { %1159 = vmatpush3.bf16.msra.mxu0 %v1321_v14  ;;  %v1352_v61 = vld [vmem:[#allocation2 + $0x188] sm:$0xff]   ;;  %v1354_v63 = vld [vmem:[#allocation2 + $0x1d0] sm:$0xff]   ;;  %v1357_v2 = vld [vmem:[#allocation2 + $0x158] sm:$0xff]  }
  0x23   :  { %1181 = vmatpush3.bf16.msra.mxu1 %v1322_v15  ;;  %1160 = vmatprep.subr.bf16.mxu0 %v1323_v16  ;;  %v91_v48 = vcombine.high %v68_v42, %v82_v43  ;;  %v90_v49 = vcombine.low %v68_v42, %v82_v43  ;;  %v93_v51 = vcombine.high %v75_v45, %v89_v46  ;;  %v1355_v0 = vld [vmem:[#allocation2 + $0x110] sm:$0xff]   ;;  %v1358_v3 = vld [vmem:[#allocation2 + $0x1d8] sm:$0xff]   ;;  %v1361_v6 = vld [vmem:[#allocation2 + $0x160] sm:$0xff]  }
  0x24   :  { %1182 = vmatprep.subr.bf16.mxu1 %v1324_v17  ;;  %v92_v52 = vcombine.low %v75_v45, %v89_v46  ;;  %v1356_v1 = vld [vmem:[#allocation2 + $0x190] sm:$0xff]   ;;  %v1359_v4 = vld [vmem:[#allocation2 + $0x118] sm:$0xff]   ;;  %v1362_v7 = vld [vmem:[#allocation2 + $0x1e0] sm:$0xff]  }
  0x25   :  { %v139_v54 = vpack.c.bf16 %v91_v48, %v91_v48  ;;  %v138_v55 = vpack.c.bf16 %v90_v49, %v90_v49  ;;  %v141_v57 = vpack.c.bf16 %v93_v51, %v93_v51  ;;  %v1360_v5 = vld [vmem:[#allocation2 + $0x198] sm:$0xff]   ;;  %v1363_v8 = vld [vmem:[#allocation2 + $0x120] sm:$0xff]   ;;  %v1365_v10 = vld [vmem:[#allocation2 + $0x168] sm:$0xff]  }
  0x26   :  { %1161 = vmatpush3.bf16.msra.mxu0 %v1325_v18  ;;  %v140_v58 = vpack.c.bf16 %v92_v52, %v92_v52  ;;  %v1364_v9 = vld [vmem:[#allocation2 + $0x1a0] sm:$0xff]   ;;  %v1366_v11 = vld [vmem:[#allocation2 + $0x1e8] sm:$0xff]   ;;  %v1369_v14 = vld [vmem:[#allocation2 + $0x170] sm:$0xff]  }
  0x27   :  { %1183 = vmatpush3.bf16.msra.mxu1 %v1326_v19  ;;  %1162 = vmatprep.subr.bf16.mxu0 %v1327_v20  ;;  %v1367_v12 = vld [vmem:[#allocation2 + $0x128] sm:$0xff]   ;;  %v1370_v15 = vld [vmem:[#allocation2 + $0x1f0] sm:$0xff]   ;;  %v1373_v18 = vld [vmem:[#allocation2 + $0x178] sm:$0xff]  }
  0x28   :  { %1184 = vmatprep.subr.bf16.mxu1 %v1328_v21  ;;  %697 = vmatprep.mubr.bf16.mxu0 %v139_v54  ;;  %v1368_v13 = vld [vmem:[#allocation2 + $0x1a8] sm:$0xff]   ;;  %v1371_v16 = vld [vmem:[#allocation2 + $0x130] sm:$0xff]   ;;  %v1374_v19 = vld [vmem:[#allocation2 + $0x1f8] sm:$0xff]  }
  0x29   :  { %737 = vmatprep.mubr.bf16.mxu1 %v141_v57  ;;  %v1372_v17 = vld [vmem:[#allocation2 + $0x1b0] sm:$0xff]   ;;  %v1375_v20 = vld [vmem:[#allocation2 + $0x138] sm:$0xff]   ;;  %v1383_v39 = vld [vmem:[%s1632_s3] sm:$0xff]  }
  0x2a   :  { %1163 = vmatpush3.bf16.msra.mxu0 %v1329_v22  ;;  %v1376_v21 = vld [vmem:[#allocation2 + $0x1b8] sm:$0xff]   ;;  %v1385_v41 = vld [vmem:[%s1632_s3 + $0x10] sm:$0xff]   ;;  %v1387_v43 = vld [vmem:[%s1632_s3 + $0x20] sm:$0xff]  }
  0x2b   :  { %1185 = vmatpush3.bf16.msra.mxu1 %v1330_v23  ;;  %1164 = vmatprep.subr.bf16.mxu0 %v1331_v27  ;;  %v1377_v22 = vld [vmem:[%s1629_s0 + $0x8] ss:$16 sps:$4 sm:$0xff]   ;;  %v1381_v24 = vld [vmem:[%s1629_s0 + $0xc] ss:$16 sps:$4 sm:$0xff]   ;;  %v1389_v45 = vld [vmem:[%s1632_s3 + $0x30] sm:$0xff]  }
  0x2c   :  { %1186 = vmatprep.subr.bf16.mxu1 %v1332_v28  ;;  %v1379_v23 = vld [vmem:[%s1629_s0 + $0x28] ss:$16 sps:$4 sm:$0xff]   ;;  %v1382_v25 = vld [vmem:[%s1629_s0 + $0x2c] ss:$16 sps:$4 sm:$0xff]   ;;  %v104_v26 = vrot.slane %v1377_v22, %v1508_v37  ;;  %v111_v28 = vrot.slane %v1381_v24, %v1508_v37  ;;  %v1393_v49 = vld [vmem:[%s1634_s5 + $0x10] sm:$0xff]  }
  0x2d   :  { %v118_v27 = vrot.slane %v1379_v23, %v1508_v37  ;;  %v1386_v42 = vld [vmem:[%s1632_s3 + $0x18] sm:$0xff]   ;;  %v1392_v48 = vld [vmem:[%s1634_s5 + $0x8] sm:$0xff]   ;;  %v1395_v51 = vld [vmem:[%s1634_s5 + $0x20] sm:$0xff]  }
  0x2e   :  { %1165 = vmatpush3.bf16.msra.mxu0 %v1333_v29  ;;  %v125_v29 = vrot.slane %v1382_v25, %v1508_v37  ;;  %v1384_v37 = vld [vmem:[%s1632_s3 + $0x8] sm:$0xff]   ;;  %v1390_v46 = vld [vmem:[%s1632_s3 + $0x38] sm:$0xff]  }
  0x2f   :  { %1187 = vmatpush3.bf16.msra.mxu1 %v1334_v30  ;;  %1166 = vmatprep.subr.bf16.mxu0 %v1335_v33  ;;  %v127_v30 = vcombine.high %v104_v26, %v118_v27  ;;  %v126_v31 = vcombine.low %v104_v26, %v118_v27  ;;  %v1396_v52 = vld [vmem:[%s1634_s5 + $0x28] sm:$0xff]   ;;  %v1143_v26 = vld [vmem:[%s1635_s6] ss:$0 sm:$0xff] }
  0x30   :  { %1188 = vmatprep.subr.bf16.mxu1 %v1336_v34  ;;  %v129_v32 = vcombine.high %v111_v28, %v125_v29  ;;  %v128_v33 = vcombine.low %v111_v28, %v125_v29 }
  0x31   :  { %v143_v34 = vpack.c.bf16 %v127_v30, %v127_v30 }
  0x32   :  { %1167 = vmatpush3.bf16.msra.mxu0 %v1337_v35  ;;  %v142_v35 = vpack.c.bf16 %v126_v31, %v126_v31  ;;  %v144_v38 = vpack.c.bf16 %v128_v33, %v128_v33 }
  0x33   :  { %1189 = vmatpush3.bf16.msra.mxu1 %v1338_v36  ;;  %1196 = vmatprep.subr.bf16.mxu0 %v1345_v44  ;;  %v145_v36 = vpack.c.bf16 %v129_v32, %v129_v32  ;;  %v1388_v44 = vld [vmem:[%s1632_s3 + $0x28] sm:$0xff]  }
  0x34   :  { %1218 = vmatprep.subr.bf16.mxu1 %v1346_v47  ;;  %v1391_v47 = vld [vmem:[%s1634_s5] sm:$0xff]  }
  0x35   :  { %698 = vmatmul.mubr.bf16.vlgmr.msra.gmra.mrb[0].mxu0 %v138_v55  ;;  %v1069_v55 = vld [vmem:[%s1631_s2] ss:$0 sm:$0xff] }
  0x36   :  { %738 = vmatmul.mubr.bf16.vlgmr.msra.gmra.mrb[0].mxu1 %v140_v58  ;;  %1197 = vmatpush3.bf16.msra.mxu0 %v1347_v50  ;;  %v1394_v50 = vld [vmem:[%s1634_s5 + $0x18] sm:$0xff]  }
  0x37   :  { %1219 = vmatpush3.bf16.msra.mxu1 %v1348_v53  ;;  %1198 = vmatprep.subr.bf16.mxu0 %v1349_v56 }
  0x38   :  { %1220 = vmatprep.subr.bf16.mxu1 %v1350_v59  ;;  %777 = vmatprep.mubr.bf16.mxu0 %v143_v34 }
  0x39   :  { %817 = vmatprep.mubr.bf16.mxu1 %v145_v36 }
  0x3a   :  { %1199 = vmatpush3.bf16.msra.mxu0 %v1351_v60 }
  0x3b   :  { %1221 = vmatpush3.bf16.msra.mxu1 %v1352_v61  ;;  %1200 = vmatprep.subr.bf16.mxu0 %v1353_v62 }
  0x3c   :  { %1222 = vmatprep.subr.bf16.mxu1 %v1354_v63 }
  0x3e   :  { %1201 = vmatpush3.bf16.msra.mxu0 %v1355_v0 }
  0x3f   :  { %1223 = vmatpush3.bf16.msra.mxu1 %v1356_v1  ;;  %1202 = vmatprep.subr.bf16.mxu0 %v1357_v2 }
  0x40   :  { %1224 = vmatprep.subr.bf16.mxu1 %v1358_v3 }
  0x42   :  { %1203 = vmatpush3.bf16.msra.mxu0 %v1359_v4 }
  0x43   :  { %1225 = vmatpush3.bf16.msra.mxu1 %v1360_v5  ;;  %1204 = vmatprep.subr.bf16.mxu0 %v1361_v6 }
  0x44   :  { %1226 = vmatprep.subr.bf16.mxu1 %v1362_v7 }
  0x46   :  { %1205 = vmatpush3.bf16.msra.mxu0 %v1363_v8 }
  0x47   :  { %1227 = vmatpush3.bf16.msra.mxu1 %v1364_v9  ;;  %1206 = vmatprep.subr.bf16.mxu0 %v1365_v10 }
  0x48   :  { %1228 = vmatprep.subr.bf16.mxu1 %v1366_v11 }
  0x4a   :  { %1207 = vmatpush3.bf16.msra.mxu0 %v1367_v12 }
  0x4b   :  { %1229 = vmatpush3.bf16.msra.mxu1 %v1368_v13  ;;  %1208 = vmatprep.subr.bf16.mxu0 %v1369_v14 }
  0x4c   :  { %1230 = vmatprep.subr.bf16.mxu1 %v1370_v15 }
  0x4e   :  { %1209 = vmatpush3.bf16.msra.mxu0 %v1371_v16  ;;  %v1397_v16 = vld [vmem:[%s1634_s5 + $0x30] sm:$0xff]  }
  0x4f   :  { %1231 = vmatpush3.bf16.msra.mxu1 %v1372_v17  ;;  %1210 = vmatprep.subr.bf16.mxu0 %v1373_v18  ;;  %v1398_v17 = vld [vmem:[%s1634_s5 + $0x38] sm:$0xff]   ;;  %v1134_v18 = vld [vmem:[%s1633_s4] ss:$0 sm:$0xff] }
  0x50   :  { %1232 = vmatprep.subr.bf16.mxu1 %v1374_v19 }
  0x52   :  { %1211 = vmatpush3.bf16.msra.mxu0 %v1375_v20 }
  0x53   :  { %1233 = vmatpush3.bf16.msra.mxu1 %v1376_v21  ;;  %1258 = vmatprep.subr.bf16.mxu0 %v1451_v40 }
  0x54   :  { %1278 = vmatprep.subr.bf16.mxu1 %v1451_v40 }
  0x55   :  { %778 = vmatmul.mubr.bf16.vlgmr.msra.gmra.mrb[4].mxu0 %v142_v35 }
  0x56   :  { %818 = vmatmul.mubr.bf16.vlgmr.msra.gmra.mrb[4].mxu1 %v144_v38  ;;  %1259 = vmatpush3.bf16.msra.mxu0 %v1383_v39 }
  0x57   :  { %1260 = vmatprep.subr.bf16.mxu0 %v1451_v40  ;;  %1274 = vmatprep.mubr.msk.bf16.mxu0 %vm1452_vm0, %v1451_v40 }
  0x58   :  { %1294 = vmatprep.mubr.msk.bf16.mxu1 %vm1452_vm0, %v1451_v40  ;;  %1279 = vmatpush3.bf16.msra.mxu1 %v1391_v47 }
  0x59   :  { %1280 = vmatprep.subr.bf16.mxu1 %v1451_v40 }
  0x5a   :  { %1261 = vmatpush3.bf16.msra.mxu0 %v1384_v37 }
  0x5b   :  { %1262 = vmatprep.subr.bf16.mxu0 %v1451_v40 }
  0x5c   :  { %1281 = vmatpush3.bf16.msra.mxu1 %v1392_v48 }
  0x5d   :  { %1282 = vmatprep.subr.bf16.mxu1 %v1451_v40 }
  0x5e   :  { %1263 = vmatpush3.bf16.msra.mxu0 %v1385_v41 }
  0x5f   :  { %1264 = vmatprep.subr.bf16.mxu0 %v1451_v40 }
  0x60   :  { %1283 = vmatpush3.bf16.msra.mxu1 %v1393_v49 }
  0x61   :  { %1284 = vmatprep.subr.bf16.mxu1 %v1451_v40 }
  0x62   :  { %1265 = vmatpush3.bf16.msra.mxu0 %v1386_v42 }
  0x63   :  { %1266 = vmatprep.subr.bf16.mxu0 %v1451_v40 }
  0x64   :  { %1285 = vmatpush3.bf16.msra.mxu1 %v1394_v50 }
  0x65   :  { %1286 = vmatprep.subr.bf16.mxu1 %v1451_v40 }
  0x66   :  { %1267 = vmatpush3.bf16.msra.mxu0 %v1387_v43 }
  0x67   :  { %1268 = vmatprep.subr.bf16.mxu0 %v1451_v40 }
  0x68   :  { %1287 = vmatpush3.bf16.msra.mxu1 %v1395_v51 }
  0x69   :  { %1288 = vmatprep.subr.bf16.mxu1 %v1451_v40 }
  0x6a   :  { %1269 = vmatpush3.bf16.msra.mxu0 %v1388_v44 }
  0x6b   :  { %1270 = vmatprep.subr.bf16.mxu0 %v1451_v40 }
  0x6c   :  { %1289 = vmatpush3.bf16.msra.mxu1 %v1396_v52 }
  0x6d   :  { %1290 = vmatprep.subr.bf16.mxu1 %v1451_v40 }
  0x6e   :  { %1271 = vmatpush3.bf16.msra.mxu0 %v1389_v45 }
  0x6f   :  { %1272 = vmatprep.subr.bf16.mxu0 %v1451_v40 }
  0x70   :  { %1291 = vmatpush3.bf16.msra.mxu1 %v1397_v16 }
  0x71   :  { %1292 = vmatprep.subr.bf16.mxu1 %v1451_v40 }
  0x72   :  { %1273 = vmatpush3.bf16.msra.mxu0 %v1390_v46 }
  0x74   :  { %1293 = vmatpush3.bf16.msra.mxu1 %v1398_v17 }
 0x108   :  { %v1168_v53 = vpop.f32.mrb[0].mxu0 }
 0x109   :  { %v1190_v54 = vpop.f32.mrb[0].mxu1  ;;  %v1169_v56 = vpop.f32.mrb[1].mxu0 }
 0x10a   :  { %v1170_v57 = vadd.f32 %v1169_v56, %v1168_v53  ;;  %v1191_v58 = vpop.f32.mrb[1].mxu1  ;;  %v1171_v59 = vpop.f32.mrb[2].mxu0 }
 0x10b   :  { %v1192_v60 = vadd.f32 %v1191_v58, %v1190_v54  ;;  %v1193_v61 = vpop.f32.mrb[2].mxu1  ;;  %v1172_v62 = vpop.f32.mrb[3].mxu0 }
 0x10c   :  { %v700_v63 = vadd.f32 %v1170_v57, %v1069_v55  ;;  %v1194_v0 = vpop.f32.mrb[3].mxu1 }
 0x10e   :  { %v740_v1 = vadd.f32 %v1192_v60, %v700_v63 }
 0x128   :  { %v1212_v2 = vpop.f32.mrb[4].mxu0 }
 0x129   :  { %v1234_v3 = vpop.f32.mrb[4].mxu1  ;;  %v1213_v4 = vpop.f32.mrb[5].mxu0 }
 0x12a   :  { %v1214_v5 = vadd.f32 %v1213_v4, %v1212_v2  ;;  %v1235_v6 = vpop.f32.mrb[5].mxu1  ;;  %v1215_v7 = vpop.f32.mrb[6].mxu0 }
 0x12b   :  { %v1236_v8 = vadd.f32 %v1235_v6, %v1234_v3  ;;  %v1237_v9 = vpop.f32.mrb[6].mxu1  ;;  %v1216_v10 = vpop.f32.mrb[7].mxu0 }
 0x12c   :  { %v780_v11 = vadd.f32 %v1214_v5, %v740_v1  ;;  %v1238_v12 = vpop.f32.mrb[7].mxu1 }
 0x12e   :  { %v820_v13 = vadd.f32 %v1236_v8, %v780_v11 }
 0x130   :  { %v825_v14 = vmax.f32 %v820_v13, 0.0 }
 0x132   :  { %v826_v15 = vpack.c.bf16 %v825_v14, %v825_v14 }
 0x134   :  { %1275 = vmatmul.mubr.bf16.vlgmr.msra.gmra.mrb[8].mxu0 %v826_v15 }
 0x207   :  { %v932_v19 = vpop.f32.mrb[8].mxu0 }
 0x208   :  { %v933_v20 = vadd.f32 %v1134_v18, %v932_v19  ;;  %v1276_v21 = vpop.f32.mrb[9].mxu0 }
 0x209   :  { %v935_v22 = vpop.f32.mrb[10].mxu0 }
 0x20a   :  { %v938_v23 = vmax.f32 %v933_v20, 0.0  ;;  %v1277_v24 = vpop.f32.mrb[11].mxu0 }
 0x20c   :  { %v939_v25 = vpack.c.bf16 %v938_v23, %v938_v23 }
 0x20e   :  { %1295 = vmatmul.mubr.bf16.vlgmr.msra.gmra.mrb[8].mxu1 %v939_v25 }
 0x2e1   :  { %v1045_v27 = vpop.f32.mrb[8].mxu1 }
 0x2e2   :  { %v1046_v28 = vadd.f32 %v1143_v26, %v1045_v27  ;;  %v1296_v29 = vpop.f32.mrb[9].mxu1 }
 0x2e3   :  { %v1048_v30 = vpop.f32.mrb[10].mxu1 }
 0x2e4   :  { %1051 = vst [vmem:[#allocation5] sm:$0xff] %v1046_v28  ;;  %v1297_v31 = vpop.f32.mrb[11].mxu1 }
 0x2e5   :  { %1056 = vsyncadd [#allocation4], 96  ;;  %s1453_s4 = smov [#allocation5]  }
 0x2e6   :  { %s1057_s5 = sshll.u32 %s1453_s4, 4  ;;  %s1058_s5 = int_to_ptr.vmem [resolvable:$true] %s1057_s5 }
 0x2e7   :  { %s1421_s16 = scalar_lea.vmem %s1058_s5, 32  ;;  %s1425_s17 = scalar_lea.vmem %s1058_s5, 128 }
 0x2e8   :  { %p1422_p8 = scmp.ne.s32.totalorder %s1058_s5, %s1421_s16  ;;  %p1426_p9 = scmp.lt.s32.totalorder %s1058_s5, %s1058_s5 }
 0x2e9   :  { %p1427_p10 = scmp.lt.s32.totalorder %s1425_s17, %s1421_s16 }
 0x2eb   :  { %p1428_p11 = por %p1427_p10, %p1426_p9 }
 0x2ed   :  { %p1429_p12 = pnand %p1428_p11, %p1422_p8 }
 0x2ef   :  { %1432 = shalt.err (!%p1429_p12)
}
 0x2f0   :  { %s1433_s19 = scalar_lea.hbm %s1636_s7, 32 }
 0x2f1   :  { %p1434_p13 = scmp.ne.s32.totalorder %s1636_s7, %s1433_s19  ;;  %p1437_p0 = scmp.lt.u32.totalorder %s1433_s19, %s1636_s7 }
 0x2f3   :  { %p1439_p1 = pnand %p1437_p0, %p1434_p13 }
 0x2f5   :  { %1442 = shalt.err (!%p1439_p1)
}
 0x2f6   :  { %s1454_s24 = smov 32   ;;  %s1455_s25 = smov 2  }
 0x2f7   :  { %1063 = dma.vmem_to_hbm [thread:$0]  %s1058_s5, 32, %s1636_s7, [#allocation4], %s1454_s24, %s1454_s24, %s1455_s25  }
 0x2f8   :  { %1445 = dma.done.wait [#allocation4], 128  }
 0x2f9   :  { %1446 = vsyncadd [#allocation4], 4294967168 }
 0x2fa   :  { %1067 = vsyncpa [#allocation3], 1 }
 0x2fb   :  { %1068 = vsyncpa [#allocation4], 1 }

</bundles_post_ra>
